<compile_context>
chip_gen: v7x
topology: tpu7x:2x2x1
jax: 0.10.0
libtpu: 0.0.40
codegen_flags: <defaults>
</compile_context>

<pallas_src>
import functools
import math

import jax
import jax.numpy as jnp
from jax.experimental import pallas as pl
from jax.experimental.pallas import tpu as pltpu


# ----------------------------------------------------------------------------
# Generation-aware sizing
# ----------------------------------------------------------------------------

def _vmem_capacity_bytes():
    try:
        return int(pltpu.get_tpu_info().vmem_capacity_bytes)
    except Exception:
        return 64 * 1024 * 1024          # conservative: assume v7x (64 MiB/TC)


_VMEM_BYTES = _vmem_capacity_bytes()
_BIG_VMEM = _VMEM_BYTES >= 96 * 1024 * 1024           # v5e / v6e: 128 MiB
_VMEM_LIMIT = (64 << 20) if _BIG_VMEM else (32 << 20)
_MM_M_CANDS = (512, 256, 128)
_MM_NK_CANDS = (1024, 512, 256, 128) if _BIG_VMEM else (512, 256, 128)
_LN_FUSE_MAX_N = 2048     # fuse add+LN into the matmul finalize when N <= this


def _tile(dim, candidates=(512, 256, 128)):
    """Largest candidate tile dividing `dim`, else the full dim (full-dim
    blocks are always legal w.r.t. the (8, 128) constraint)."""
    for c in candidates:
        if dim >= c and dim % c == 0:
            return c
    return dim


def _maybe_pad_rows(x, multiple=128):
    """Pad the leading (row) dim to a multiple of 128 for large ragged M so the
    _tile fallback never yields a single giant block; small M stays one block."""
    m = x.shape[0]
    pad = (-m) % multiple
    if m > multiple and pad:
        return jnp.pad(x, ((0, pad), (0, 0))), m
    return x, m


# ----------------------------------------------------------------------------
# Tiled matmul (+ optional bias / ReLU / fused residual-add + LayerNorm)
# bf16 inputs, f32 MXU accumulation.
# ----------------------------------------------------------------------------

def _matmul_kernel(*refs, n_k, relu, has_bias, fuse_ln):
    it = iter(refs)
    x_ref = next(it)
    w_ref = next(it)
    b_ref = next(it) if has_bias else None
    if fuse_ln:
        r_ref = next(it)
        g_ref = next(it)
        beta_ref = next(it)
    o_ref = next(it)
    acc_ref = next(it)

    @pl.when(pl.program_id(2) == 0)
    def _():
        acc_ref[...] = jnp.zeros(acc_ref.shape, acc_ref.dtype)

    acc_ref[...] += jnp.dot(x_ref[...], w_ref[...],
                            preferred_element_type=jnp.float32)

    @pl.when(pl.program_id(2) == n_k - 1)
    def _():
        y = acc_ref[...]
        if has_bias:
            y = y + b_ref[...]
        if relu:
            y = jnp.maximum(y, 0.0)
        if fuse_ln:
            # residual add + LayerNorm fused into the matmul epilogue
            y = y + r_ref[...].astype(jnp.float32)
            mu = jnp.mean(y, axis=-1, keepdims=True)
            yc = y - mu
            var = jnp.mean(yc * yc, axis=-1, keepdims=True)
            y = yc * jax.lax.rsqrt(var + 1e-5) * g_ref[...] + beta_ref[...]
        o_ref[...] = y.astype(o_ref.dtype)


def pl_matmul(x, w, b=None, relu=False, residual=None, gamma=None, beta=None,
              out_dtype=jnp.bfloat16):
    """x: [M, K] bf16, w: [K, N] bf16, b: [1, N] f32 (optional).
    If `residual`/`gamma`/`beta` are given, residual-add + LayerNorm over N is
    fused into the finalize (requires N to fit a single tile)."""
    fuse_ln = residual is not None
    x, m_orig = _maybe_pad_rows(x)
    if fuse_ln:
        residual, _ = _maybe_pad_rows(residual)
    M, K = x.shape
    N = w.shape[1]

    tm = _tile(M, _MM_M_CANDS)
    if fuse_ln:
        tn = N                                   # LN needs the full feature dim
        tk = _tile(K, (512, 256, 128))
    else:
        tn = _tile(N, _MM_NK_CANDS)
        tk = _tile(K, _MM_NK_CANDS)
    n_k = K // tk
    has_bias = b is not None

    in_specs = [
        pl.BlockSpec((tm, tk), lambda i, j, k: (i, k)),
        pl.BlockSpec((tk, tn), lambda i, j, k: (k, j)),
    ]
    args = [x, w]
    if has_bias:
        in_specs.append(pl.BlockSpec((1, tn), lambda i, j, k: (0, j)))
        args.append(b)
    if fuse_ln:
        in_specs += [
            pl.BlockSpec((tm, tn), lambda i, j, k: (i, 0)),
            pl.BlockSpec((1, tn), lambda i, j, k: (0, 0)),
            pl.BlockSpec((1, tn), lambda i, j, k: (0, 0)),
        ]
        args += [residual, gamma, beta]

    out = pl.pallas_call(
        functools.partial(_matmul_kernel, n_k=n_k, relu=relu,
                          has_bias=has_bias, fuse_ln=fuse_ln),
        out_shape=jax.ShapeDtypeStruct((M, N), out_dtype),
        grid=(M // tm, N // tn, n_k),
        in_specs=in_specs,
        out_specs=pl.BlockSpec((tm, tn), lambda i, j, k: (i, j)),
        scratch_shapes=[pltpu.VMEM((tm, tn), jnp.float32)],
        compiler_params=pltpu.CompilerParams(
            dimension_semantics=("parallel", "parallel", "arbitrary"),
            vmem_limit_bytes=_VMEM_LIMIT),
    )(*args)
    if out.shape[0] != m_orig:
        out = out[:m_orig]
    return out


# ----------------------------------------------------------------------------
# Standalone residual-add + LayerNorm (fallback when H is too large to fuse)
# ----------------------------------------------------------------------------

def _add_ln_kernel(x_ref, a_ref, g_ref, b_ref, o_ref):
    x = x_ref[...].astype(jnp.float32) + a_ref[...].astype(jnp.float32)
    mu = jnp.mean(x, axis=-1, keepdims=True)
    xc = x - mu
    var = jnp.mean(xc * xc, axis=-1, keepdims=True)
    y = xc * jax.lax.rsqrt(var + 1e-5) * g_ref[...] + b_ref[...]
    o_ref[...] = y.astype(o_ref.dtype)


def pl_add_layernorm(x2, a2, gamma, beta):
    x2, m_orig = _maybe_pad_rows(x2)
    a2, _ = _maybe_pad_rows(a2)
    M, H = x2.shape
    tm = _tile(M, _MM_M_CANDS)
    y = pl.pallas_call(
        _add_ln_kernel,
        out_shape=jax.ShapeDtypeStruct((M, H), jnp.bfloat16),
        grid=(M // tm,),
        in_specs=[
            pl.BlockSpec((tm, H), lambda i: (i, 0)),
            pl.BlockSpec((tm, H), lambda i: (i, 0)),
            pl.BlockSpec((1, H), lambda i: (0, 0)),
            pl.BlockSpec((1, H), lambda i: (0, 0)),
        ],
        out_specs=pl.BlockSpec((tm, H), lambda i: (i, 0)),
        compiler_params=pltpu.CompilerParams(
            dimension_semantics=("parallel",),
            vmem_limit_bytes=_VMEM_LIMIT),
    )(x2, a2, gamma, beta)
    if y.shape[0] != m_orig:
        y = y[:m_orig]
    return y


def matmul_residual_ln(x2, w, residual, gamma, beta, b=None):
    """wo / ffn_w2 projection with residual-add + LayerNorm, fused when possible."""
    N = w.shape[1]
    if N <= _LN_FUSE_MAX_N:
        return pl_matmul(x2, w, b=b, residual=residual, gamma=gamma, beta=beta)
    y = pl_matmul(x2, w, b=b)
    return pl_add_layernorm(residual, y, gamma, beta)


# ----------------------------------------------------------------------------
# Flash-style attention: heads packed along the last axis (no transposes)
# ----------------------------------------------------------------------------

def _flash_attn_kernel(q_ref, k_ref, v_ref, o_ref, m_ref, l_ref, acc_ref, *,
                       heads, dk, dv, scale, causal, tq, tk, n_k):
    qi = pl.program_id(1)
    ki = pl.program_id(2)

    @pl.when(ki == 0)
    def _():
        m_ref[...] = jnp.full(m_ref.shape, -jnp.inf, m_ref.dtype)
        l_ref[...] = jnp.zeros(l_ref.shape, l_ref.dtype)
        acc_ref[...] = jnp.zeros(acc_ref.shape, acc_ref.dtype)

    def compute():
        # Fold the 1/sqrt(dk) scale into q ONCE per tile (vs per-head per-score).
        q = (q_ref[0].astype(jnp.float32) * scale).astype(q_ref.dtype)
        k = k_ref[0]                       # [tk, heads*dk] bf16
        v = v_ref[0]                       # [tk, heads*dv] bf16
        if causal:
            # Mask built once per tile, reused for every head.
            row = qi * tq + jax.lax.broadcasted_iota(jnp.int32, (tq, tk), 0)
            col = ki * tk + jax.lax.broadcasted_iota(jnp.int32, (tq, tk), 1)
            keep = col <= row
        for h in range(heads):                       # static per-head loop
            qh = q[:, h * dk:(h + 1) * dk]
            kh = k[:, h * dk:(h + 1) * dk]
            vh = v[:, h * dv:(h + 1) * dv]
            # s = qh @ kh^T without an explicit transpose (contract last dims).
            s = jax.lax.dot_general(
                qh, kh, (((1,), (1,)), ((), ())),
                preferred_element_type=jnp.float32)           # [tq, tk] f32
            if causal:
                s = jnp.where(keep, s, -1e30)
            m_prev = m_ref[h]                                 # [tq, 1]
            m_new = jnp.maximum(m_prev, jnp.max(s, axis=-1, keepdims=True))
            alpha = jnp.exp(m_prev - m_new)
            p = jnp.exp(s - m_new)
            l_ref[h] = alpha * l_ref[h] + jnp.sum(p, axis=-1, keepdims=True)
            acc_ref[:, h * dv:(h + 1) * dv] = (
                alpha * acc_ref[:, h * dv:(h + 1) * dv]
                + jnp.dot(p.astype(vh.dtype), vh,
                          preferred_element_type=jnp.float32))
            m_ref[h] = m_new

    if causal:
        # Fully-masked k/v tiles: compute skipped here, DMA skipped via the
        # clamped k/v index_map in pl_attention (block index unchanged).
        @pl.when(ki * tk <= qi * tq + (tq - 1))
        def _():
            compute()
    else:
        compute()

    @pl.when(ki == n_k - 1)
    def _():
        for h in range(heads):
            inv = pl.reciprocal(l_ref[h], approx=True)        # [tq, 1]
            acc_ref[:, h * dv:(h + 1) * dv] = acc_ref[:, h * dv:(h + 1) * dv] * inv
        # single lane-dense output store
        o_ref[0] = acc_ref[...].astype(o_ref.dtype)


def pl_attention(q, k, v, heads, dk, dv, causal=False):
    """q: [B, Lq, heads*dk], k: [B, Lk, heads*dk], v: [B, Lk, heads*dv] (bf16)."""
    # TODO(synk): Lq/Lk that are not tile multiples fall back to a single
    #             full-length block (fine for small demo shapes); pad+mask for
    #             large ragged sequence lengths is not implemented.
    B, Lq, Hq = q.shape
    Lk = k.shape[1]
    Hv = heads * dv
    tq = _tile(Lq, (512, 256, 128))
    tk = _tile(Lk, (256, 128))
    n_k = Lk // tk
    scale = 1.0 / math.sqrt(dk)

    if causal:
        # Clamp ki to the last tile that intersects the causal band for this
        # query tile: Pallas skips the K/V DMA when the block index repeats.
        def kv_map(b, qi, ki):
            last_valid = (qi * tq + (tq - 1)) // tk
            return (b, jnp.minimum(ki, last_valid), 0)
    else:
        def kv_map(b, qi, ki):
            return (b, ki, 0)

    kernel = functools.partial(
        _flash_attn_kernel, heads=heads, dk=dk, dv=dv, scale=scale,
        causal=causal, tq=tq, tk=tk, n_k=n_k)

    return pl.pallas_call(
        kernel,
        out_shape=jax.ShapeDtypeStruct((B, Lq, Hv), q.dtype),
        grid=(B, Lq // tq, n_k),
        in_specs=[
            pl.BlockSpec((1, tq, Hq), lambda b, qi, ki: (b, qi, 0)),
            pl.BlockSpec((1, tk, Hq), kv_map),
            pl.BlockSpec((1, tk, Hv), kv_map),
        ],
        out_specs=pl.BlockSpec((1, tq, Hv), lambda b, qi, ki: (b, qi, 0)),
        scratch_shapes=[
            pltpu.VMEM((heads, tq, 1), jnp.float32),    # running max
            pltpu.VMEM((heads, tq, 1), jnp.float32),    # running sum
            pltpu.VMEM((tq, Hv), jnp.float32),          # lane-dense accumulator
        ],
        compiler_params=pltpu.CompilerParams(
            dimension_semantics=("parallel", "parallel", "arbitrary"),
            vmem_limit_bytes=_VMEM_LIMIT),
    )(q, k, v)


# ----------------------------------------------------------------------------
# Output head: weight-norm folded outside; online softmax over the V axis.
# Pass 1: per-(tm, tv) block exp(z - blockmax) + tiny per-row stats.
# Pass 2: in-place rescale by exp(blockmax - globalmax) / globalsum.
# No scratch or resident block scales with V -> safe on v7x's 64 MiB VMEM.
# ----------------------------------------------------------------------------

def _outfc_pass1_kernel(x_ref, w_ref, e_ref, mb_ref, mfin_ref, lfin_ref,
                        m_run, l_run, *, n_v):
    j = pl.program_id(1)

    @pl.when(j == 0)
    def _():
        m_run[...] = jnp.full(m_run.shape, -jnp.inf, m_run.dtype)
        l_run[...] = jnp.zeros(l_run.shape, l_run.dtype)

    z = jnp.dot(x_ref[...], w_ref[...], preferred_element_type=jnp.float32)
    mb = jnp.max(z, axis=-1, keepdims=True)          # block-local max  [tm,1]
    p = jnp.exp(z - mb)
    e_ref[...] = p.astype(e_ref.dtype)
    mb_ref[0] = mb

    m_prev = m_run[...]
    m_new = jnp.maximum(m_prev, mb)
    l_run[...] = (l_run[...] * jnp.exp(m_prev - m_new)
                  + jnp.sum(p, axis=-1, keepdims=True) * jnp.exp(mb - m_new))
    m_run[...] = m_new

    @pl.when(j == n_v - 1)
    def _():
        mfin_ref[...] = m_run[...]
        lfin_ref[...] = l_run[...]


def _outfc_norm_kernel(e_ref, mb_ref, mfin_ref, lfin_ref, o_ref):
    rescale = jnp.exp(mb_ref[0] - mfin_ref[...]) / lfin_ref[...]
    o_ref[...] = (e_ref[...].astype(jnp.float32) * rescale).astype(o_ref.dtype)


def pl_out_fc(x, w, out_dtype=jnp.bfloat16):
    """x: [M, H] bf16, w: [H, V] bf16 (weight-norm pre-folded) -> [M, V] probs."""
    x, m_orig = _maybe_pad_rows(x)
    M, H = x.shape
    V = w.shape[1]
    tm = _tile(M, _MM_M_CANDS)
    tv = _tile(V, (512, 256, 128))
    n_v = V // tv

    e, mb, mfin, lfin = pl.pallas_call(
        functools.partial(_outfc_pass1_kernel, n_v=n_v),
        out_shape=(jax.ShapeDtypeStruct((M, V), jnp.bfloat16),
                   jax.ShapeDtypeStruct((n_v, M, 1), jnp.float32),
                   jax.ShapeDtypeStruct((M, 1), jnp.float32),
                   jax.ShapeDtypeStruct((M, 1), jnp.float32)),
        grid=(M // tm, n_v),
        in_specs=[
            pl.BlockSpec((tm, H), lambda i, j: (i, 0)),
            pl.BlockSpec((H, tv), lambda i, j: (0, j)),
        ],
        out_specs=(
            pl.BlockSpec((tm, tv), lambda i, j: (i, j)),      # lane-dense exp blocks
            pl.BlockSpec((1, tm, 1), lambda i, j: (j, i, 0)),  # per-block max
            pl.BlockSpec((tm, 1), lambda i, j: (i, 0)),        # global max
            pl.BlockSpec((tm, 1), lambda i, j: (i, 0)),        # global sum
        ),
        scratch_shapes=[pltpu.VMEM((tm, 1), jnp.float32),
                        pltpu.VMEM((tm, 1), jnp.float32)],
        compiler_params=pltpu.CompilerParams(
            dimension_semantics=("parallel", "arbitrary"),
            vmem_limit_bytes=_VMEM_LIMIT),
    )(x, w)

    alias = {0: 0} if out_dtype == jnp.bfloat16 else {}
    probs = pl.pallas_call(
        _outfc_norm_kernel,
        out_shape=jax.ShapeDtypeStruct((M, V), out_dtype),
        grid=(M // tm, n_v),
        in_specs=[
            pl.BlockSpec((tm, tv), lambda i, j: (i, j)),
            pl.BlockSpec((1, tm, 1), lambda i, j: (j, i, 0)),
            pl.BlockSpec((tm, 1), lambda i, j: (i, 0)),
            pl.BlockSpec((tm, 1), lambda i, j: (i, 0)),
        ],
        out_specs=pl.BlockSpec((tm, tv), lambda i, j: (i, j)),
        input_output_aliases=alias,
        compiler_params=pltpu.CompilerParams(
            dimension_semantics=("parallel", "parallel"),
            vmem_limit_bytes=_VMEM_LIMIT),
    )(e, mb, mfin, lfin)

    if probs.shape[0] != m_orig:
        probs = probs[:m_orig]
    return probs


# ----------------------------------------------------------------------------
# Transformer glue (plain JAX reshapes/slices + Pallas compute)
# ----------------------------------------------------------------------------

def mha_self(x, p, heads, dk, dv, causal):
    B, L, H = x.shape
    hd = heads * dk
    hv = heads * dv
    qkv = pl_matmul(x.reshape(B * L, H), p["wqkv"]).reshape(B, L, 2 * hd + hv)
    q = qkv[..., :hd]
    k = qkv[..., hd:2 * hd]
    v = qkv[..., 2 * hd:]
    return pl_attention(q, k, v, heads, dk, dv, causal=causal)


def mha_cross(x, mem, p, heads, dk, dv):
    B, Lq, H = x.shape
    Lk = mem.shape[1]
    hd = heads * dk
    hv = heads * dv
    q = pl_matmul(x.reshape(B * Lq, H), p["wq"]).reshape(B, Lq, hd)
    kv = pl_matmul(mem.reshape(B * Lk, H), p["wkv"]).reshape(B, Lk, hd + hv)
    k = kv[..., :hd]
    v = kv[..., hd:]
    return pl_attention(q, k, v, heads, dk, dv, causal=False)


def encoder_layer(x, p, heads, dk, dv):
    B, L, H = x.shape
    hv = heads * dv
    x2 = x.reshape(B * L, H)
    o = mha_self(x, p["self_attn"], heads, dk, dv, causal=False)
    x2 = matmul_residual_ln(o.reshape(B * L, hv), p["self_attn"]["wo"],
                            x2, p["ln1_g"], p["ln1_b"])
    h1 = pl_matmul(x2, p["ffn_w1"], p["ffn_b1"], relu=True)
    x2 = matmul_residual_ln(h1, p["ffn_w2"], x2, p["ln2_g"], p["ln2_b"],
                            b=p["ffn_b2"])
    return x2.reshape(B, L, H)


def decoder_layer(x, mem, p, heads, dk, dv):
    B, L, H = x.shape
    hv = heads * dv
    x2 = x.reshape(B * L, H)
    o = mha_self(x, p["self_attn"], heads, dk, dv, causal=True)
    x2 = matmul_residual_ln(o.reshape(B * L, hv), p["self_attn"]["wo"],
                            x2, p["ln1_g"], p["ln1_b"])
    o = mha_cross(x2.reshape(B, L, H), mem, p["cross_attn"], heads, dk, dv)
    x2 = matmul_residual_ln(o.reshape(B * L, hv), p["cross_attn"]["wo"],
                            x2, p["ln2_g"], p["ln2_b"])
    h1 = pl_matmul(x2, p["ffn_w1"], p["ffn_b1"], relu=True)
    x2 = matmul_residual_ln(h1, p["ffn_w2"], x2, p["ln3_g"], p["ln3_b"],
                            b=p["ffn_b2"])
    return x2.reshape(B, L, H)


def translator_forward(params, source, inp, source_mask=None):
    """source: [B, src_len, h_size], inp: [B, tgt_len, h_size]
    returns:   [B, tgt_len, vocab_size] softmax probabilities (bf16)."""
    # TODO(synk): only the source_mask=None path of the reference forward is supported.
    heads = params["heads"]
    dk = dv = params["k_size"]
    mem = source.astype(jnp.bfloat16)
    for p in params["encoder"]:
        mem = encoder_layer(mem, p, heads, dk, dv)
    out = inp.astype(jnp.bfloat16)
    for p in params["decoder"]:
        out = decoder_layer(out, mem, p, heads, dk, dv)
    B, L, H = out.shape
    probs = pl_out_fc(out.reshape(B * L, H), params["out_w"])
    return probs.reshape(B, L, -1)


# ----------------------------------------------------------------------------
# Deterministic parameter initialization
# ----------------------------------------------------------------------------

class _KeyGen:
    def __init__(self, key):
        self._key = key
        self._i = 0

    def __call__(self):
        self._i += 1
        return jax.random.fold_in(self._key, self._i)


def _init(key, shape, scale=0.05):
    return (scale * jax.random.normal(key, shape, jnp.float32)).astype(jnp.bfloat16)


def init_translator_params(key, vocab_size, layers, heads, h_size, k_size):
    kg = _KeyGen(key)
    hd = heads * k_size

    def self_attn_params():
        return dict(
            wqkv=_init(kg(), (h_size, 3 * hd)),      # fused q|k|v projection
            wo=_init(kg(), (hd, h_size)),
        )

    def cross_attn_params():
        return dict(
            wq=_init(kg(), (h_size, hd)),
            wkv=_init(kg(), (h_size, 2 * hd)),       # fused k|v projection
            wo=_init(kg(), (hd, h_size)),
        )

    def base_layer():
        return dict(
            self_attn=self_attn_params(),
            ln1_g=jnp.ones((1, h_size), jnp.float32),
            ln1_b=jnp.zeros((1, h_size), jnp.float32),
            ln2_g=jnp.ones((1, h_size), jnp.float32),
            ln2_b=jnp.zeros((1, h_size), jnp.float32),
            ffn_w1=_init(kg(), (h_size, 4 * h_size)),
            ffn_b1=jnp.zeros((1, 4 * h_size), jnp.float32),
            ffn_w2=_init(kg(), (4 * h_size, h_size)),
            ffn_b2=jnp.zeros((1, h_size), jnp.float32),
        )

    def dec_layer():
        d = base_layer()
        d["cross_attn"] = cross_attn_params()
        d["ln3_g"] = jnp.ones((1, h_size), jnp.float32)
        d["ln3_b"] = jnp.zeros((1, h_size), jnp.float32)
        return d

    # weight_norm(Linear(h_size, vocab, bias=False)):  W = g * v / ||v|| (per row).
    # Fold the normalization with the actual g once (static at inference) and
    # pre-transpose to [h_size, vocab] so out_fc is lane-dense over V.
    out_v = 0.05 * jax.random.normal(kg(), (vocab_size, h_size), jnp.float32)
    row_norm = jnp.sqrt(jnp.sum(out_v * out_v, axis=1, keepdims=True))
    out_g = row_norm                          # PyTorch weight_norm init: g = ||v||
    out_w = (out_v * (out_g / row_norm)).T.astype(jnp.bfloat16)

    return dict(
        heads=heads,
        k_size=k_size,
        encoder=[base_layer() for _ in range(layers)],
        decoder=[dec_layer() for _ in range(layers)],
        out_w=out_w,
    )


# ----------------------------------------------------------------------------
# Demo
# ----------------------------------------------------------------------------

if __name__ == "__main__":
    vocab_size, layers, heads, h_size, k_size = 64, 2, 2, 32, 16
    B, src_len, tgt_len = 2, 8, 8

    key = jax.random.PRNGKey(0)
    k_params, k_src, k_inp = jax.random.split(key, 3)

    params = init_translator_params(k_params, vocab_size, layers, heads, h_size, k_size)
    source = jax.random.normal(k_src, (B, src_len, h_size), jnp.float32)
    inp = jax.random.normal(k_inp, (B, tgt_len, h_size), jnp.float32)

    out = translator_forward(params, source, inp, source_mask=None)
    out = jax.block_until_ready(out)

    assert out.shape == (B, tgt_len, vocab_size), out.shape
    # Softmax(dim=-1) output: rows must sum to 1 (bf16 probs -> loose tolerance).
    row_sums = jnp.sum(out.astype(jnp.float32), axis=-1)
    assert bool(jnp.all(jnp.abs(row_sums - 1.0) < 2e-2)), "softmax rows do not sum to 1"

    print("KERNEL_OK")
</pallas_src>

<mosaic_0001>
module attributes {stable_mosaic.version = 11 : i64} {
  func.func @_matmul_kernel(%arg0: i32, %arg1: i32, %arg2: i32, %arg3: memref<16x32xbf16, #tpu.memory_space<vmem>>, %arg4: memref<32x96xbf16, #tpu.memory_space<vmem>>, %arg5: memref<16x96xbf16, #tpu.memory_space<vmem>>, %arg6: memref<16x96xf32, #tpu.memory_space<vmem>>) attributes {dimension_semantics = [#tpu.dimension_semantics<parallel>, #tpu.dimension_semantics<parallel>, #tpu.dimension_semantics<arbitrary>], iteration_bounds = array<i64: 1, 1, 1>, scalar_prefetch = 0 : i64, scratch_operands = 1 : i64, tpu.core_type = #tpu.core_type<tc>, window_params = [{transform_indices = @transform_0, window_bounds = array<i64: 16, 32>}, {transform_indices = @transform_1, window_bounds = array<i64: 32, 96>}, {transform_indices = @transform_2, window_bounds = array<i64: 16, 96>}]} {
    %c0_i32 = arith.constant 0 : i32
    %0 = arith.cmpi eq, %arg2, %c0_i32 : i32
    %1 = arith.extui %0 : i1 to i32
    %c0_i32_0 = arith.constant 0 : i32
    %2 = arith.cmpi ne, %1, %c0_i32_0 : i32
    scf.if %2 {
      %cst_10 = arith.constant 0.000000e+00 : f32
      %12 = vector.broadcast %cst_10 : f32 to vector<16x96xf32>
      %c0_11 = arith.constant 0 : index
      %c0_12 = arith.constant 0 : index
      %13 = vector.load %arg6[%c0_11, %c0_12] : memref<16x96xf32, #tpu.memory_space<vmem>>, vector<16x96xf32>
      tpu.vector_store %arg6[%c0_11, %c0_12], %12 {strides = array<i32>} : memref<16x96xf32, #tpu.memory_space<vmem>>, vector<16x96xf32>,
    } else {
    }
    %c0 = arith.constant 0 : index
    %c0_1 = arith.constant 0 : index
    %3 = vector.load %arg6[%c0, %c0_1] : memref<16x96xf32, #tpu.memory_space<vmem>>, vector<16x96xf32>
    %c0_2 = arith.constant 0 : index
    %c0_3 = arith.constant 0 : index
    %4 = vector.load %arg3[%c0_2, %c0_3] : memref<16x32xbf16, #tpu.memory_space<vmem>>, vector<16x32xbf16>
    %c0_4 = arith.constant 0 : index
    %c0_5 = arith.constant 0 : index
    %5 = vector.load %arg4[%c0_4, %c0_5] : memref<32x96xbf16, #tpu.memory_space<vmem>>, vector<32x96xbf16>
    %cst = arith.constant dense<0.000000e+00> : vector<16x96xf32>
    %6 = tpu.matmul %4, %5, %cst {dimension_numbers = #tpu.dot_dimension_numbers<[1], [0], [0], [1], [0, 0, 1, 1], [], []>} : vector<16x32xbf16>, vector<32x96xbf16>, vector<16x96xf32> -> vector<16x96xf32>
    %7 = arith.addf %3, %6 : vector<16x96xf32>
    %c0_6 = arith.constant 0 : index
    %c0_7 = arith.constant 0 : index
    %8 = vector.load %arg6[%c0_6, %c0_7] : memref<16x96xf32, #tpu.memory_space<vmem>>, vector<16x96xf32>
    tpu.vector_store %arg6[%c0_6, %c0_7], %7 {strides = array<i32>} : memref<16x96xf32, #tpu.memory_space<vmem>>, vector<16x96xf32>,
    %c0_i32_8 = arith.constant 0 : i32
    %9 = arith.cmpi eq, %arg2, %c0_i32_8 : i32
    %10 = arith.extui %9 : i1 to i32
    %c0_i32_9 = arith.constant 0 : i32
    %11 = arith.cmpi ne, %10, %c0_i32_9 : i32
    scf.if %11 {
      %c0_10 = arith.constant 0 : index
      %c0_11 = arith.constant 0 : index
      %12 = vector.load %arg6[%c0_10, %c0_11] : memref<16x96xf32, #tpu.memory_space<vmem>>, vector<16x96xf32>
      %13 = arith.truncf %12 : vector<16x96xf32> to vector<16x96xbf16>
      %c0_12 = arith.constant 0 : index
      %c0_13 = arith.constant 0 : index
      %14 = vector.load %arg5[%c0_12, %c0_13] : memref<16x96xbf16, #tpu.memory_space<vmem>>, vector<16x96xbf16>
      tpu.vector_store %arg5[%c0_12, %c0_13], %13 {strides = array<i32>} : memref<16x96xbf16, #tpu.memory_space<vmem>>, vector<16x96xbf16>,
    } else {
    }
    return
  }
  func.func @transform_0(%arg0: i32, %arg1: i32, %arg2: i32) -> (i32, i32) {
    %c0_i32 = arith.constant 0 : i32
    return %arg0, %arg2 : i32, i32
  }
  func.func @transform_1(%arg0: i32, %arg1: i32, %arg2: i32) -> (i32, i32) {
    %c0_i32 = arith.constant 0 : i32
    return %arg2, %arg1 : i32, i32
  }
  func.func @transform_2(%arg0: i32, %arg1: i32, %arg2: i32) -> (i32, i32) {
    %c0_i32 = arith.constant 0 : i32
    return %arg0, %arg1 : i32, i32
  }
}

</mosaic_0001>

<bundles_post_ra>
// kernel: tpu_custom_call.1
= control target key start
LH: loop header
LB: loop body
LE: loop exit
PB: predicated region body
PF: predicated region fallthrough
CT: control target
= control target key end

     0   :  { %7 = vsyncpa [#allocation4], 0  ;;  %s329_s0 = inlined_call_operand.hbm [shape: bf16[16,32], index: 0, kind: input, shape index: {}]   ;;  %s330_s1 = inlined_call_operand.hbm [shape: bf16[32,96], index: 1, kind: input, shape index: {}]   ;;  %s331_s2 = inlined_call_operand.hbm [shape: bf16[16,96], index: 2, kind: output, shape index: {}]  }
   0x1   :  { %8 = vsyncpa [#allocation7], 0 }
   0x2   :  { %9 = vsyncpa [#allocation5], 0  ;;  %s258_s9 = smov [#allocation3]   ;;  %s186_s13 = scalar_lea.hbm %s329_s0, 128 }
   0x3   :  { %s15_s10 = sshll.u32 %s258_s9, 4  ;;  %p187_p0 = scmp.ne.s32.totalorder %s329_s0, %s186_s13  ;;  %s16_s10 = int_to_ptr.vmem [resolvable:$true] %s15_s10 }
   0x4   :  { %p190_p1 = scmp.lt.u32.totalorder %s186_s13, %s329_s0 }
   0x6   :  { %p192_p2 = pnand %p190_p1, %p187_p0 }
   0x8   :  { %195 = shalt.err (!%p192_p2)
}
   0x9   :  { %s196_s18 = scalar_lea.vmem %s16_s10, 128  ;;  %p201_p4 = scmp.lt.s32.totalorder %s16_s10, %s16_s10 }
   0xa   :  { %p197_p3 = scmp.ne.s32.totalorder %s16_s10, %s196_s18  ;;  %p202_p5 = scmp.lt.s32.totalorder %s196_s18, %s196_s18 }
   0xc   :  { %p203_p6 = por %p202_p5, %p201_p4 }
   0xe   :  { %p204_p7 = pnand %p203_p6, %p197_p3 }
  0x10   :  { %207 = shalt.err (!%p204_p7)
}
  0x11   :  { %s259_s19 = smov 64   ;;  %s260_s20 = smov 4  }
  0x12   :  { %21 = dma.hbm_to_vmem [thread:$0]  %s329_s0, 128, %s16_s10, [#allocation4], %s259_s19, %s259_s19, %s260_s20  }
  0x13   :  { %s261_s23 = smov [#allocation6]   ;;  %s208_s27 = scalar_lea.hbm %s330_s1, 256 }
  0x14   :  { %s27_s24 = sshll.u32 %s261_s23, 4  ;;  %p209_p8 = scmp.ne.s32.totalorder %s330_s1, %s208_s27  ;;  %s28_s24 = int_to_ptr.vmem [resolvable:$true] %s27_s24 }
  0x15   :  { %p212_p9 = scmp.lt.u32.totalorder %s208_s27, %s330_s1 }
  0x17   :  { %p214_p10 = pnand %p212_p9, %p209_p8 }
  0x19   :  { %217 = shalt.err (!%p214_p10)
}
  0x1a   :  { %s218_s4 = scalar_lea.vmem %s28_s24, 256  ;;  %p223_p12 = scmp.lt.s32.totalorder %s28_s24, %s28_s24 }
  0x1b   :  { %p219_p11 = scmp.ne.s32.totalorder %s28_s24, %s218_s4  ;;  %p224_p13 = scmp.lt.s32.totalorder %s218_s4, %s218_s4 }
  0x1d   :  { %p225_p0 = por %p224_p13, %p223_p12 }
  0x1f   :  { %p226_p1 = pnand %p225_p0, %p219_p11 }
  0x21   :  { %229 = shalt.err (!%p226_p1)
}
  0x22   :  { %33 = dma.hbm_to_vmem [thread:$0]  %s330_s1, 256, %s28_s24, [#allocation7], %s259_s19, %s259_s19, %s260_s20  }
  0x23   :  { %252 = dma.done.wait [#allocation4], 128  }
  0x24   :  { %253 = vsyncadd [#allocation4], 4294967168 }
  0x25   :  { %254 = dma.done.wait [#allocation7], 256  }
  0x26   :  { %255 = vsyncadd [#allocation7], 4294967040  ;;  %vm45_vm0 = vcmask 785408   ;;  %v262_v0 = vmov 0.0   ;;  %vm263_vm1 = vmmov 0   ;;  %v183_v1 = vld [vmem:[#allocation6] sm:$0xff]  }
  0x27   :  { %46 = vst.msk [vmem:[#allocation2] sm:$0xff] %vm45_vm0, %v262_v0  ;;  %47 = vst.msk [vmem:[#allocation2 + $0x8] sm:$0xff] %vm45_vm0, %v262_v0  ;;  %168 = vmatprep.subr.bf16.mxu0 %v262_v0  ;;  %172 = vmatprep.mubr.msk.bf16.mxu0 %vm263_vm1, %v262_v0  ;;  %v184_v2 = vld [vmem:[#allocation6 + $0x8] sm:$0xff]   ;;  %v185_v3 = vld [vmem:[#allocation3] sm:$0xff]   ;;  %vm73_vm2 = vcmask 261120   ;;  %vm136_vm3 = vcmask 781312  }
  0x28   :  { %169 = vmatpush3.bf16.msra.mxu0 %v183_v1  ;;  %s264_s1 = smov [#allocation8]  }
  0x29   :  { %170 = vmatprep.subr.bf16.mxu0 %v262_v0  ;;  %s144_s6 = sshll.u32 %s264_s1, 4  ;;  %s145_s6 = int_to_ptr.vmem [resolvable:$true] %s144_s6 }
  0x2a   :  { %s230_s7 = scalar_lea.vmem %s145_s6, 128  ;;  %p235_p3 = scmp.lt.s32.totalorder %s145_s6, %s145_s6 }
  0x2b   :  { %p231_p2 = scmp.ne.s32.totalorder %s145_s6, %s230_s7  ;;  %p236_p4 = scmp.lt.s32.totalorder %s230_s7, %s230_s7 }
  0x2c   :  { %171 = vmatpush3.bf16.msra.mxu0 %v184_v2 }
  0x2d   :  { %p237_p5 = por %p236_p4, %p235_p3 }
  0x2e   :  { %v48_v4 = vld [vmem:[#allocation2] sm:$0xff]  ;;  %v49_v6 = vld [vmem:[#allocation2 + $0x8] sm:$0xff] }
  0x2f   :  { %173 = vmatmul.mubr.msk.bf16.vlgmr.msra.gmra.mrb[0].mxu0 %vm73_vm2, %v185_v3  ;;  %p238_p6 = pnand %p237_p5, %p231_p2 }
 0x102   :  { %v111_v5 = vpop.f32.mrb[0].mxu0 }
 0x103   :  { %v118_v7 = vadd.f32 %v111_v5, %v48_v4  ;;  %v174_v8 = vpop.f32.mrb[1].mxu0 }
 0x104   :  { %v114_v9 = vpop.f32.mrb[2].mxu0 }
 0x105   :  { %121 = vst.msk [vmem:[#allocation2] sm:$0xff] %vm45_vm0, %v118_v7  ;;  %v119_v10 = vadd.f32 %v114_v9, %v49_v6  ;;  %v175_v11 = vpop.f32.mrb[3].mxu0 }
 0x107   :  { %122 = vst.msk [vmem:[#allocation2 + $0x8] sm:$0xff] %vm45_vm0, %v119_v10 }
 0x10c   :  { %v126_v12 = vld [vmem:[#allocation2] sm:$0xff] }
 0x10d   :  { %v163_v13 = vpack.c.bf16 %v126_v12, %v126_v12 }
 0x10e   :  { %v127_v14 = vld [vmem:[#allocation2 + $0x8] sm:$0xff] }
 0x10f   :  { %v164_v15 = vpack.c.bf16 %v127_v14, %v127_v14  ;;  %137 = vst.msk [vmem:[#allocation8] sm:$0xf] %vm136_vm3, %v163_v13 }
 0x111   :  { %138 = vst.msk [vmem:[#allocation8 + $0x4] sm:$0xf] %vm136_vm3, %v164_v15 }
 0x112   :  { %241 = shalt.err (!%p238_p6)
}
 0x113   :  { %s242_s10 = scalar_lea.hbm %s331_s2, 128 }
 0x114   :  { %p243_p7 = scmp.ne.s32.totalorder %s331_s2, %s242_s10  ;;  %p246_p8 = scmp.lt.u32.totalorder %s242_s10, %s331_s2 }
 0x116   :  { %p248_p9 = pnand %p246_p8, %p243_p7 }
 0x118   :  { %251 = shalt.err (!%p248_p9)
}
 0x119   :  { %150 = dma.vmem_to_hbm [thread:$0]  %s145_s6, 128, %s331_s2, [#allocation5], %s259_s19, %s259_s19, %s260_s20  }
 0x11a   :  { %256 = dma.done.wait [#allocation5], 128  }
 0x11b   :  { %257 = vsyncadd [#allocation5], 4294967168 }
 0x11c   :  { %154 = vsyncpa [#allocation4], 1 }
 0x11d   :  { %155 = vsyncpa [#allocation7], 1 }
 0x11e   :  { %156 = vsyncpa [#allocation5], 1 }

</bundles_post_ra>
